<compile_context>
chip_gen: v7x
topology: tpu7x:2x2x1
jax: 0.10.0
libtpu: 0.0.40
codegen_flags: <defaults>
</compile_context>

<pallas_src>
import jax
import jax.numpy as jnp
from jax.experimental import pallas as pl
from jax.experimental.pallas import tpu as pltpu

_OFFSET = 3.8859


def linear_sub_relu_kernel(x_ref, w_ref, b_ref, o_ref):
    # One MXU matmul with f32 accumulation, then bias-add / constant-subtract /
    # relu on the VPU (f32 epilogue — keep it f32 even if inputs become bf16,
    # v5e's VPU has no bf16 support).
    acc = jnp.dot(x_ref[...], w_ref[...], preferred_element_type=jnp.float32)
    o_ref[...] = jnp.maximum(acc + b_ref[...] - _OFFSET, 0.0).astype(o_ref.dtype)


def linear_sub_relu(x, w, b):
    B, IN = x.shape
    IN2, OUT = w.shape
    assert IN == IN2 and b.shape == (OUT,)
    # Free metadata reshape so the bias is a 2-D (1, OUT) tile in VMEM; no
    # arithmetic is done on it host-side (the -3.8859 lives in the kernel).
    b2d = b.reshape(1, OUT)

    vmem_spec = pl.BlockSpec(memory_space=pltpu.MemorySpace.VMEM)
    cost = pl.CostEstimate(
        flops=2 * B * IN * OUT,
        transcendentals=0,
        bytes_accessed=(B * IN + IN * OUT + OUT + B * OUT) * 4,
    )
    # TODO(synk): if B/OUT ever grow to non-toy sizes, reintroduce a batch-tiled
    # grid (B multiple of 8, OUT multiple of 128 for lane-dense stores), mark the
    # batch axis "parallel" (2x on v7x's dual TensorCores), and feed bf16
    # x/w to the MXU on v6e/v7x while keeping the f32 epilogue.
    return pl.pallas_call(
        linear_sub_relu_kernel,
        out_shape=jax.ShapeDtypeStruct((B, OUT), x.dtype),
        in_specs=[vmem_spec, vmem_spec, vmem_spec],
        out_specs=vmem_spec,
        cost_estimate=cost,
    )(x, w, b2d)


if __name__ == "__main__":
    key = jax.random.PRNGKey(0)
    kx, kw, kb = jax.random.split(key, 3)

    B, IN, OUT = 2, 32, 64
    x1 = jax.random.normal(kx, (B, IN), dtype=jnp.float32)

    # Deterministic "nn.Linear(32, 64)" parameters (uniform(-1/sqrt(IN), 1/sqrt(IN))
    # like PyTorch's default init), stored pre-transposed as (IN, OUT).
    bound = 1.0 / jnp.sqrt(jnp.float32(IN))
    w = jax.random.uniform(kw, (IN, OUT), minval=-bound, maxval=bound,
                           dtype=jnp.float32)
    b = jax.random.uniform(kb, (OUT,), minval=-bound, maxval=bound,
                           dtype=jnp.float32)

    out = linear_sub_relu(x1, w, b)
    jax.block_until_ready(out)

    # Reference check in plain JAX (matches the PyTorch forward semantics).
    ref = jnp.maximum(x1 @ w + b - 3.8859, 0.0)
    assert out.shape == (B, OUT)
    assert jnp.allclose(out, ref, atol=1e-5, rtol=1e-5)

    print("KERNEL_OK")
</pallas_src>

<mosaic_0001>
module attributes {stable_mosaic.version = 11 : i64} {
  func.func @linear_sub_relu_kernel(%arg0: memref<2x32xf32, #tpu.memory_space<vmem>>, %arg1: memref<32x64xf32, #tpu.memory_space<vmem>>, %arg2: memref<1x64xf32, #tpu.memory_space<vmem>>, %arg3: memref<2x64xf32, #tpu.memory_space<vmem>>) attributes {dimension_semantics = [], scalar_prefetch = 0 : i64, scratch_operands = 0 : i64, tpu.core_type = #tpu.core_type<tc>} {
    %c0 = arith.constant 0 : index
    %c0_0 = arith.constant 0 : index
    %0 = vector.load %arg0[%c0, %c0_0] : memref<2x32xf32, #tpu.memory_space<vmem>>, vector<2x32xf32>
    %c0_1 = arith.constant 0 : index
    %c0_2 = arith.constant 0 : index
    %1 = vector.load %arg1[%c0_1, %c0_2] : memref<32x64xf32, #tpu.memory_space<vmem>>, vector<32x64xf32>
    %cst = arith.constant dense<0.000000e+00> : vector<2x64xf32>
    %2 = tpu.matmul %0, %1, %cst {dimension_numbers = #tpu.dot_dimension_numbers<[1], [0], [0], [1], [0, 0, 1, 1], [], []>} : vector<2x32xf32>, vector<32x64xf32>, vector<2x64xf32> -> vector<2x64xf32>
    %c0_3 = arith.constant 0 : index
    %c0_4 = arith.constant 0 : index
    %3 = vector.load %arg2[%c0_3, %c0_4] : memref<1x64xf32, #tpu.memory_space<vmem>>, vector<1x64xf32>
    %4 = vector.broadcast %3 : vector<1x64xf32> to vector<2x64xf32>
    %5 = arith.addf %2, %4 : vector<2x64xf32>
    %cst_5 = arith.constant 3.885900e+00 : f32
    %6 = vector.broadcast %cst_5 : f32 to vector<2x64xf32>
    %7 = arith.subf %5, %6 : vector<2x64xf32>
    %cst_6 = arith.constant 0.000000e+00 : f32
    %8 = vector.broadcast %cst_6 : f32 to vector<2x64xf32>
    %9 = arith.maximumf %7, %8 : vector<2x64xf32>
    %c0_7 = arith.constant 0 : index
    %c0_8 = arith.constant 0 : index
    %10 = vector.load %arg3[%c0_7, %c0_8] : memref<2x64xf32, #tpu.memory_space<vmem>>, vector<2x64xf32>
    tpu.vector_store %arg3[%c0_7, %c0_8], %9 {strides = array<i32>} : memref<2x64xf32, #tpu.memory_space<vmem>>, vector<2x64xf32>,
    return
  }
}

</mosaic_0001>

<bundles_post_ra>
// kernel: tpu_custom_call.1
= control target key start
LH: loop header
LB: loop body
LE: loop exit
PB: predicated region body
PF: predicated region fallthrough
CT: control target
= control target key end

     0   :  { %8 = vsyncpa [#allocation3], 0  ;;  %s326_s0 = inlined_call_operand.hbm [shape: f32[2,32], index: 0, kind: input, shape index: {}]   ;;  %s327_s1 = inlined_call_operand.hbm [shape: f32[32,64], index: 1, kind: input, shape index: {}]   ;;  %s328_s2 = inlined_call_operand.vmem [shape: f32[1,64], index: 2, kind: input, shape index: {}]   ;;  %s329_s3 = inlined_call_operand.hbm [shape: f32[2,64], index: 3, kind: output, shape index: {}]  }
   0x1   :  { %9 = vsyncpa [#allocation6], 0 }
   0x2   :  { %10 = vsyncpa [#allocation4], 0  ;;  %s252_s12 = smov [#allocation2]   ;;  %s253_s14 = smov [#allocation5]  }
   0x3   :  { %s17_s13 = sshll.u32 %s252_s12, 4  ;;  %s26_s15 = sshll.u32 %s253_s14, 4  ;;  %s18_s13 = int_to_ptr.vmem [resolvable:$true] %s17_s13  ;;  %s280_s15 = int_to_ptr.vmem [resolvable:$true] %s26_s15 }
   0x4   :  { %s180_s18 = scalar_lea.hbm %s326_s0, 32 }
   0x5   :  { %p181_p0 = scmp.ne.s32.totalorder %s326_s0, %s180_s18  ;;  %p184_p1 = scmp.lt.u32.totalorder %s180_s18, %s326_s0 }
   0x7   :  { %p186_p2 = pnand %p184_p1, %p181_p0 }
   0x9   :  { %189 = shalt.err (!%p186_p2)
}
   0xa   :  { %s190_s23 = scalar_lea.vmem %s18_s13, 32  ;;  %p195_p4 = scmp.lt.s32.totalorder %s18_s13, %s18_s13 }
   0xb   :  { %p191_p3 = scmp.ne.s32.totalorder %s18_s13, %s190_s23  ;;  %p196_p5 = scmp.lt.s32.totalorder %s190_s23, %s190_s23 }
   0xd   :  { %p197_p6 = por %p196_p5, %p195_p4 }
   0xf   :  { %p198_p7 = pnand %p197_p6, %p191_p3 }
  0x11   :  { %201 = shalt.err (!%p198_p7)
}
  0x12   :  { %20 = dma.hbm_to_vmem [thread:$0]  %s326_s0, 32, %s18_s13, [#allocation3]  }
  0x13   :  { %s202_s28 = scalar_lea.hbm %s327_s1, 512 }
  0x14   :  { %p203_p8 = scmp.ne.s32.totalorder %s327_s1, %s202_s28  ;;  %p206_p9 = scmp.lt.u32.totalorder %s202_s28, %s327_s1 }
  0x16   :  { %p208_p10 = pnand %p206_p9, %p203_p8 }
  0x18   :  { %211 = shalt.err (!%p208_p10)
}
  0x19   :  { %s212_s6 = scalar_lea.vmem %s280_s15, 512  ;;  %p217_p12 = scmp.lt.s32.totalorder %s280_s15, %s280_s15 }
  0x1a   :  { %p213_p11 = scmp.ne.s32.totalorder %s280_s15, %s212_s6  ;;  %p218_p13 = scmp.lt.s32.totalorder %s212_s6, %s212_s6 }
  0x1c   :  { %p219_p0 = por %p218_p13, %p217_p12 }
  0x1e   :  { %p220_p1 = pnand %p219_p0, %p213_p11 }
  0x20   :  { %223 = shalt.err (!%p220_p1)
}
  0x21   :  { %s254_s0 = smov 128   ;;  %s255_s7 = smov 8  }
  0x22   :  { %32 = dma.hbm_to_vmem [thread:$0]  %s327_s1, 512, %s280_s15, [#allocation6], %s254_s0, %s254_s0, %s255_s7  }
  0x23   :  { %246 = dma.done.wait [#allocation3], 32  }
  0x24   :  { %247 = vsyncadd [#allocation3], 4294967264 }
  0x25   :  { %248 = dma.done.wait [#allocation6], 512  }
  0x26   :  { %249 = vsyncadd [#allocation6], 4294966784  ;;  %v256_v0 = vmov 0.0|0.0   ;;  %vm257_vm0 = vmmov 0   ;;  %v258_v1 = vmov 0.0   ;;  %v42_v2 = vld [vmem:[#allocation5] sm:$0xff] }
  0x27   :  { %166 = vmatprep.subr.bf16.mxu0 %v256_v0  ;;  %163 = vmatprep.mubr.msk.f32.mxu0 %vm257_vm0, %v258_v1  ;;  %v43_v3 = vld [vmem:[#allocation5 + $0x8] sm:$0xff]  ;;  %v44_v4 = vld [vmem:[#allocation5 + $0x10] sm:$0xff]  ;;  %v45_v6 = vld [vmem:[#allocation5 + $0x18] sm:$0xff]  ;;  %vm53_vm1 = vcmask 261120   ;;  %s259_s11 = smov [#allocation7]   ;;  %vm129_vm2 = vcmask 517120  }
  0x28   :  { %v167_v5 = vpack.c.bf16 %v43_v3, %v42_v2  ;;  %v170_v7 = vpack.c.bf16 %v45_v6, %v44_v4  ;;  %v41_v8 = vld [vmem:[#allocation2] sm:$0x3]  ;;  %s137_s12 = sshll.u32 %s259_s11, 4  ;;  %s138_s12 = int_to_ptr.vmem [resolvable:$true] %s137_s12 }
  0x29   :  { %v147_v9 = vld [vmem:[%s328_s2] ss:$0 sm:$0xff]  ;;  %s224_s13 = scalar_lea.vmem %s138_s12, 32  ;;  %p229_p3 = scmp.lt.s32.totalorder %s138_s12, %s138_s12 }
  0x2a   :  { %168 = vmatpush3.bf16.msra.mxu0 %v167_v5  ;;  %p225_p2 = scmp.ne.s32.totalorder %s138_s12, %s224_s13  ;;  %p230_p4 = scmp.lt.s32.totalorder %s224_s13, %s224_s13 }
  0x2b   :  { %169 = vmatprep.subr.bf16.mxu0 %v256_v0 }
  0x2c   :  { %p231_p5 = por %p230_p4, %p229_p3 }
  0x2e   :  { %171 = vmatpush3.bf16.msra.mxu0 %v170_v7  ;;  %p232_p6 = pnand %p231_p5, %p225_p2 }
  0x31   :  { %164 = vmatmul.mubr.msk.f32.vlgmr.msra.gmra.mrb[0].mxu0 %vm53_vm1, %v41_v8 }
 0x104   :  { %v123_v10 = vpop.f32.mrb[0].mxu0 }
 0x105   :  { %v124_v11 = vadd.f32 %v147_v9, %v123_v10  ;;  %v165_v12 = vpop.f32.mrb[1].mxu0 }
 0x107   :  { %v149_v13 = vadd.f32 -3.8859, %v124_v11 }
 0x109   :  { %v128_v14 = vmax.f32 %v149_v13, 0.0 }
 0x10b   :  { %130 = vst.msk [vmem:[#allocation7] sm:$0x3] %vm129_vm2, %v128_v14 }
 0x10c   :  { %235 = shalt.err (!%p232_p6)
}
 0x10d   :  { %s236_s2 = scalar_lea.hbm %s329_s3, 32 }
 0x10e   :  { %p237_p7 = scmp.ne.s32.totalorder %s329_s3, %s236_s2  ;;  %p240_p8 = scmp.lt.u32.totalorder %s236_s2, %s329_s3 }
 0x110   :  { %p242_p9 = pnand %p240_p8, %p237_p7 }
 0x112   :  { %245 = shalt.err (!%p242_p9)
}
 0x113   :  { %140 = dma.vmem_to_hbm [thread:$0]  %s138_s12, 32, %s329_s3, [#allocation4]  }
 0x114   :  { %250 = dma.done.wait [#allocation4], 32  }
 0x115   :  { %251 = vsyncadd [#allocation4], 4294967264 }
 0x116   :  { %144 = vsyncpa [#allocation3], 1 }
 0x117   :  { %145 = vsyncpa [#allocation6], 1 }
 0x118   :  { %146 = vsyncpa [#allocation4], 1 }

</bundles_post_ra>
